<compile_context>
chip_gen: v6e
topology: v6e:2x2x1
jax: 0.10.0
libtpu: 0.0.40
codegen_flags: <defaults>
</compile_context>

<pallas_src>
import jax
import jax.numpy as jnp
from jax import lax
from jax.experimental import pallas as pl
from jax.experimental.pallas import tpu as pltpu

N_HIDDEN = 20
N_GAUSSIANS = 5


def mdn_kernel(x_ref, wh_ref, bh_ref, wheads_ref, bheads_ref, out_ref):
    # x_ref:      (1, TILE_N)      batch on lanes
    # wh_ref:     (H, 1)           hidden weights (column)
    # bh_ref:     (H, 1)           hidden bias (column)
    # wheads_ref: (3G, H)          fused [pi; sigma; mu] head weights
    # bheads_ref: (3G, 1)          fused head biases
    # out_ref:    (3G, TILE_N)     rows 0:G = pi, G:2G = sigma, 2G:3G = mu
    g = out_ref.shape[0] // 3

    x = x_ref[...]                                           # (1, TILE_N)

    # Hidden layer: K=1 linear done as a VPU outer product + tanh (EUP).
    z_h = jnp.tanh(wh_ref[...] * x + bh_ref[...])            # (H, TILE_N)

    # Fused head matmul on the MXU: one (3G, H) @ (H, TILE_N), lane-dense result.
    heads = (
        jnp.dot(wheads_ref[...], z_h, preferred_element_type=jnp.float32)
        + bheads_ref[...]
    )                                                        # (3G, TILE_N)

    # Row-masked epilogue: keep the natural (3G, TILE_N) vreg layout, apply
    # softmax / exp / identity per head via sublane-row masks, and finish with a
    # single full unmasked store (no sub-vreg slice writes / relayouts).
    row = lax.broadcasted_iota(jnp.int32, heads.shape, 0)    # (3G, TILE_N)
    pi_rows = row < g
    sigma_rows = jnp.logical_and(row >= g, row < 2 * g)

    # Numerically stable softmax over the pi rows only (sublane reduce -> XLU).
    pi_logits = jnp.where(pi_rows, heads, -jnp.inf)
    pi_max = jnp.max(pi_logits, axis=0, keepdims=True)
    pi_exp = jnp.exp(pi_logits - pi_max)                     # non-pi rows -> 0
    pi = pi_exp / jnp.sum(pi_exp, axis=0, keepdims=True)

    exp_heads = jnp.exp(heads)                               # sigma rows kept below

    out_ref[...] = jnp.where(pi_rows, pi,
                             jnp.where(sigma_rows, exp_heads, heads))


def mdn_forward(x, params, *, tile_n=16384):
    """x: (N, 1) float32. params: dict of weights/biases. Returns (pi, sigma, mu),
    each of shape (N, n_gaussians), matching the PyTorch module."""
    n = x.shape[0]
    h = params["wh"].shape[1]
    g = params["wpi"].shape[1]

    # ---- Pack parameters for the lane-major (batch-on-lanes) kernel layout ----
    wh_col = params["wh"].T.reshape(h, 1)                            # (H, 1)
    bh_col = params["bh"].reshape(h, 1)                              # (H, 1)
    w_heads = jnp.concatenate(
        [params["wpi"].T, params["ws"].T, params["wm"].T], axis=0)   # (3G, H)
    b_heads = jnp.concatenate(
        [params["bpi"].reshape(g, 1),
         params["bs"].reshape(g, 1),
         params["bm"].reshape(g, 1)], axis=0)                        # (3G, 1)

    # ---- Batch lives on the lane axis: pad N up to a multiple of the tile ----
    tile_n = max(128, (tile_n // 128) * 128)      # keep tile a multiple of 128
    tile = min(tile_n, pl.cdiv(n, 128) * 128)
    n_pad = pl.cdiv(n, tile) * tile
    x_lane = jnp.zeros((1, n_pad), jnp.float32).at[0, :n].set(
        x.reshape(-1).astype(jnp.float32))

    grid = (n_pad // tile,)

    out = pl.pallas_call(
        mdn_kernel,
        out_shape=jax.ShapeDtypeStruct((3 * g, n_pad), jnp.float32),
        grid_spec=pltpu.PrefetchScalarGridSpec(
            num_scalar_prefetch=0,
            grid=grid,
            in_specs=[
                pl.BlockSpec((1, tile), lambda i: (0, i)),        # x tile
                pl.BlockSpec((h, 1), lambda i: (0, 0)),           # wh (resident)
                pl.BlockSpec((h, 1), lambda i: (0, 0)),           # bh (resident)
                pl.BlockSpec((3 * g, h), lambda i: (0, 0)),       # fused head W
                pl.BlockSpec((3 * g, 1), lambda i: (0, 0)),       # fused head b
            ],
            out_specs=pl.BlockSpec((3 * g, tile), lambda i: (0, i)),
        ),
        compiler_params=pltpu.CompilerParams(
            # batch axis is embarrassingly parallel (sharded across TCs on v7x)
            dimension_semantics=("parallel",),
            # tiles stay well under a few MiB even double-buffered
            vmem_limit_bytes=32 * 1024 * 1024,
        ),
        cost_estimate=pl.CostEstimate(
            flops=n_pad * (2 * h + 2 * h * 3 * g),
            transcendentals=n_pad * (h + 4 * g),
            bytes_accessed=n_pad * 4 * (1 + 3 * g),
        ),
    )(x_lane, wh_col, bh_col, w_heads, b_heads)

    # Back to the PyTorch (N, G) layout; drop padding.
    out = out[:, :n].T              # (N, 3G)
    pi = out[:, :g]
    sigma = out[:, g:2 * g]
    mu = out[:, 2 * g:]
    return pi, sigma, mu


def init_params(key, n_hidden=N_HIDDEN, n_gaussians=N_GAUSSIANS):
    """Deterministic init mimicking PyTorch's uniform(-1/sqrt(fan_in), 1/sqrt(fan_in))."""
    ks = jax.random.split(key, 8)

    def uni(k, shape, fan_in):
        bound = 1.0 / jnp.sqrt(float(fan_in))
        return jax.random.uniform(k, shape, jnp.float32, -bound, bound)

    return {
        # Linear(1 -> n_hidden): stored as (in, out)
        "wh": uni(ks[0], (1, n_hidden), 1),
        "bh": uni(ks[1], (1, n_hidden), 1),
        # Linear(n_hidden -> n_gaussians) x 3
        "wpi": uni(ks[2], (n_hidden, n_gaussians), n_hidden),
        "bpi": uni(ks[3], (1, n_gaussians), n_hidden),
        "ws": uni(ks[4], (n_hidden, n_gaussians), n_hidden),
        "bs": uni(ks[5], (1, n_gaussians), n_hidden),
        "wm": uni(ks[6], (n_hidden, n_gaussians), n_hidden),
        "bm": uni(ks[7], (1, n_gaussians), n_hidden),
    }


def mdn_reference(x, p):
    """Pure-JAX reference of the PyTorch forward for verification."""
    z_h = jnp.tanh(x @ p["wh"] + p["bh"])
    pi = jax.nn.softmax(z_h @ p["wpi"] + p["bpi"], axis=-1)
    sigma = jnp.exp(z_h @ p["ws"] + p["bs"])
    mu = z_h @ p["wm"] + p["bm"]
    return pi, sigma, mu


if __name__ == "__main__":
    key = jax.random.PRNGKey(0)
    k_params, k_x = jax.random.split(key)

    params = init_params(k_params)
    batch = 200  # deliberately not a multiple of 128 to exercise padding
    x = jax.random.normal(k_x, (batch, 1), jnp.float32)

    # small tile so the demo exercises a multi-step grid (grid=(2,))
    pi, sigma, mu = mdn_forward(x, params, tile_n=128)
    jax.block_until_ready((pi, sigma, mu))

    # Also exercise the single-tile (default-tile) path.
    pi_b, sigma_b, mu_b = mdn_forward(x, params)
    jax.block_until_ready((pi_b, sigma_b, mu_b))

    # Check against pure-JAX reference
    pi_r, sigma_r, mu_r = mdn_reference(x, params)
    assert pi.shape == (batch, N_GAUSSIANS)
    assert sigma.shape == (batch, N_GAUSSIANS)
    assert mu.shape == (batch, N_GAUSSIANS)
    assert jnp.allclose(pi, pi_r, atol=1e-5, rtol=1e-5)
    assert jnp.allclose(sigma, sigma_r, atol=1e-5, rtol=1e-5)
    assert jnp.allclose(mu, mu_r, atol=1e-5, rtol=1e-5)
    assert jnp.allclose(pi_b, pi_r, atol=1e-5, rtol=1e-5)
    assert jnp.allclose(sigma_b, sigma_r, atol=1e-5, rtol=1e-5)
    assert jnp.allclose(mu_b, mu_r, atol=1e-5, rtol=1e-5)
    # softmax rows sum to 1
    assert jnp.allclose(jnp.sum(pi, axis=-1), jnp.ones((batch,)), atol=1e-5)

    print("KERNEL_OK")
</pallas_src>

<mosaic_0001>
module attributes {stable_mosaic.version = 11 : i64} {
  func.func @mdn_kernel(%arg0: i32, %arg1: memref<1x128xf32, #tpu.memory_space<vmem>>, %arg2: memref<20x1xf32, #tpu.memory_space<vmem>>, %arg3: memref<20x1xf32, #tpu.memory_space<vmem>>, %arg4: memref<15x20xf32, #tpu.memory_space<vmem>>, %arg5: memref<15x1xf32, #tpu.memory_space<vmem>>, %arg6: memref<15x128xf32, #tpu.memory_space<vmem>>) attributes {dimension_semantics = [#tpu.dimension_semantics<parallel>], iteration_bounds = array<i64: 2>, scalar_prefetch = 0 : i64, scratch_operands = 0 : i64, tpu.core_type = #tpu.core_type<tc>, window_params = [{transform_indices = @transform_0, window_bounds = array<i64: 1, 128>}, {pipeline_mode = #tpu.pipeline_mode<synchronous>, transform_indices = @transform_1, window_bounds = array<i64: 20, 1>}, {pipeline_mode = #tpu.pipeline_mode<synchronous>, transform_indices = @transform_2, window_bounds = array<i64: 20, 1>}, {pipeline_mode = #tpu.pipeline_mode<synchronous>, transform_indices = @transform_3, window_bounds = array<i64: 15, 20>}, {pipeline_mode = #tpu.pipeline_mode<synchronous>, transform_indices = @transform_4, window_bounds = array<i64: 15, 1>}, {transform_indices = @transform_5, window_bounds = array<i64: 15, 128>}]} {
    %c0 = arith.constant 0 : index
    %c0_0 = arith.constant 0 : index
    %0 = vector.load %arg1[%c0, %c0_0] : memref<1x128xf32, #tpu.memory_space<vmem>>, vector<1x128xf32>
    %c0_1 = arith.constant 0 : index
    %c0_2 = arith.constant 0 : index
    %1 = vector.load %arg2[%c0_1, %c0_2] : memref<20x1xf32, #tpu.memory_space<vmem>>, vector<20x1xf32>
    %2 = vector.broadcast %1 : vector<20x1xf32> to vector<20x128xf32>
    %3 = vector.broadcast %0 : vector<1x128xf32> to vector<20x128xf32>
    %4 = arith.mulf %2, %3 : vector<20x128xf32>
    %c0_3 = arith.constant 0 : index
    %c0_4 = arith.constant 0 : index
    %5 = vector.load %arg3[%c0_3, %c0_4] : memref<20x1xf32, #tpu.memory_space<vmem>>, vector<20x1xf32>
    %6 = vector.broadcast %5 : vector<20x1xf32> to vector<20x128xf32>
    %7 = arith.addf %4, %6 : vector<20x128xf32>
    %8 = math.tanh %7 : vector<20x128xf32>
    %c0_5 = arith.constant 0 : index
    %c0_6 = arith.constant 0 : index
    %9 = vector.load %arg4[%c0_5, %c0_6] : memref<15x20xf32, #tpu.memory_space<vmem>>, vector<15x20xf32>
    %cst = arith.constant dense<0.000000e+00> : vector<15x128xf32>
    %10 = tpu.matmul %9, %8, %cst {dimension_numbers = #tpu.dot_dimension_numbers<[1], [0], [0], [1], [0, 0, 1, 1], [], []>} : vector<15x20xf32>, vector<20x128xf32>, vector<15x128xf32> -> vector<15x128xf32>
    %c0_7 = arith.constant 0 : index
    %c0_8 = arith.constant 0 : index
    %11 = vector.load %arg5[%c0_7, %c0_8] : memref<15x1xf32, #tpu.memory_space<vmem>>, vector<15x1xf32>
    %12 = vector.broadcast %11 : vector<15x1xf32> to vector<15x128xf32>
    %13 = arith.addf %10, %12 : vector<15x128xf32>
    %14 = tpu.iota {dimensions = array<i32: 0>} : vector<15x128xi32>
    %c5_i32 = arith.constant 5 : i32
    %15 = vector.broadcast %c5_i32 : i32 to vector<15x128xi32>
    %16 = arith.cmpi slt, %14, %15 : vector<15x128xi32>
    %c5_i32_9 = arith.constant 5 : i32
    %17 = vector.broadcast %c5_i32_9 : i32 to vector<15x128xi32>
    %18 = arith.cmpi sge, %14, %17 : vector<15x128xi32>
    %c10_i32 = arith.constant 10 : i32
    %19 = vector.broadcast %c10_i32 : i32 to vector<15x128xi32>
    %20 = arith.cmpi slt, %14, %19 : vector<15x128xi32>
    %21 = arith.andi %18, %20 : vector<15x128xi1>
    %cst_10 = arith.constant 0xFF800000 : f32
    %22 = vector.broadcast %cst_10 : f32 to vector<15x128xf32>
    %23 = arith.select %16, %13, %22 : vector<15x128xi1>, vector<15x128xf32>
    %cst_11 = arith.constant dense<0xFF800000> : vector<128xf32>
    %24 = vector.multi_reduction <maximumf>, %23, %cst_11 [0] : vector<15x128xf32> to vector<128xf32>
    %25 = vector.shape_cast %24 : vector<128xf32> to vector<1x128xf32>
    %26 = vector.broadcast %25 : vector<1x128xf32> to vector<15x128xf32>
    %27 = arith.subf %23, %26 : vector<15x128xf32>
    %28 = math.exp %27 : vector<15x128xf32>
    %cst_12 = arith.constant dense<0.000000e+00> : vector<128xf32>
    %29 = vector.multi_reduction <add>, %28, %cst_12 [0] : vector<15x128xf32> to vector<128xf32>
    %30 = vector.shape_cast %29 : vector<128xf32> to vector<1x128xf32>
    %31 = vector.broadcast %30 : vector<1x128xf32> to vector<15x128xf32>
    %32 = arith.divf %28, %31 : vector<15x128xf32>
    %33 = math.exp %13 : vector<15x128xf32>
    %34 = arith.select %21, %33, %13 : vector<15x128xi1>, vector<15x128xf32>
    %35 = arith.select %16, %32, %34 : vector<15x128xi1>, vector<15x128xf32>
    %c0_13 = arith.constant 0 : index
    %c0_14 = arith.constant 0 : index
    %36 = vector.load %arg6[%c0_13, %c0_14] : memref<15x128xf32, #tpu.memory_space<vmem>>, vector<15x128xf32>
    tpu.vector_store %arg6[%c0_13, %c0_14], %35 {strides = array<i32>} : memref<15x128xf32, #tpu.memory_space<vmem>>, vector<15x128xf32>,
    return
  }
  func.func @transform_0(%arg0: i32) -> (i32, i32) {
    %c0_i32 = arith.constant 0 : i32
    %c0_i32_0 = arith.constant 0 : i32
    return %c0_i32, %arg0 : i32, i32
  }
  func.func @transform_1(%arg0: i32) -> (i32, i32) {
    %c0_i32 = arith.constant 0 : i32
    %c0_i32_0 = arith.constant 0 : i32
    %c0_i32_1 = arith.constant 0 : i32
    return %c0_i32, %c0_i32_0 : i32, i32
  }
  func.func @transform_2(%arg0: i32) -> (i32, i32) {
    %c0_i32 = arith.constant 0 : i32
    %c0_i32_0 = arith.constant 0 : i32
    %c0_i32_1 = arith.constant 0 : i32
    return %c0_i32, %c0_i32_0 : i32, i32
  }
  func.func @transform_3(%arg0: i32) -> (i32, i32) {
    %c0_i32 = arith.constant 0 : i32
    %c0_i32_0 = arith.constant 0 : i32
    %c0_i32_1 = arith.constant 0 : i32
    return %c0_i32, %c0_i32_0 : i32, i32
  }
  func.func @transform_4(%arg0: i32) -> (i32, i32) {
    %c0_i32 = arith.constant 0 : i32
    %c0_i32_0 = arith.constant 0 : i32
    %c0_i32_1 = arith.constant 0 : i32
    return %c0_i32, %c0_i32_0 : i32, i32
  }
  func.func @transform_5(%arg0: i32) -> (i32, i32) {
    %c0_i32 = arith.constant 0 : i32
    %c0_i32_0 = arith.constant 0 : i32
    return %c0_i32, %arg0 : i32, i32
  }
}

</mosaic_0001>

<bundles_post_ra>
// kernel: tpu_custom_call.1
= control target key start
LH: loop header
LB: loop body
LE: loop exit
PB: predicated region body
PF: predicated region fallthrough
CT: control target
= control target key end

     0   :  { %10 = vsyncpa [#allocation3], 0  ;;  %s815_s0 = inlined_call_operand.vmem [shape: f32[1,256], index: 0, kind: input, shape index: {}]   ;;  %s816_s1 = inlined_call_operand.vmem [shape: f32[20,1], index: 1, kind: input, shape index: {}]   ;;  %s817_s2 = inlined_call_operand.vmem [shape: f32[20,1], index: 2, kind: input, shape index: {}]   ;;  %s818_s3 = inlined_call_operand.vmem [shape: f32[15,20], index: 3, kind: input, shape index: {}]   ;;  %s819_s4 = inlined_call_operand.vmem [shape: f32[15,1], index: 4, kind: input, shape index: {}]   ;;  %s820_s5 = inlined_call_operand.hbm [shape: f32[15,256], index: 5, kind: output, shape index: {}]  }
   0x1   :  { %12 = vsyncpa [#allocation3 + $0x1], 0  ;;  %s675_s18 = smov 0   ;;  %s677_s19 = smov 0  }
   0x2   :  { %s679_s20 = smov 0   ;;  %s681_s21 = smov 0  }
   0x3 LB: > { %s696_s22 = sadd.s32 4294967295, %s638_s21   ;;  %s490_s23 = sadd.s32 4294967294, %s638_s21   ;;  %s638_s21 = sphi %s681_s21, %s826_s21   ;;  %s634_s20 = sphi %s679_s20, %s825_s20   ;;  %s630_s19 = sphi %s677_s19, %s824_s19   ;;  %s626_s18 = sphi %s675_s18, %s823_s18  }
   0x4   : > { %s700_s24 = sadd.s32 1, %s638_s21   ;;  %s135_s25 = sadd.s32 1, %s634_s20 }
   0x5   : > { %s132_s26 = ssub.s32 %s638_s21, %s700_s24  ;;  %p145_p0 = scmp.ne.s32.totalorder %s634_s20, %s630_s19 }
   0x6   : > { %p133_p1 = scmp.eq.s32.totalorder %s132_s26, 0  ;;  %p146_p2 = scmp.eq.s32.totalorder %s696_s22, 1 }
   0x7   : > { %p151_p3 = scmp.ne.s32.totalorder %s630_s19, %s626_s18  ;;  %p152_p4 = scmp.eq.s32.totalorder %s490_s23, 1 }
   0x8   : > { %s711_s27 = scalar_select %p133_p1, %s634_s20, %s135_s25  }
   0x9   : > { %p713_p5 = por %p146_p2, %p145_p0  ;;  %p717_p6 = por %p152_p4, %p151_p3 }
   0xa   : > { %p493_p7 = scmp.ge.s32.totalorder %s638_s21, 1  ;;  %p188_p8 = scmp.lt.s32.totalorder %s638_s21, 3 }
   0xc   : > { %p189_p9 = pnand %p493_p7, %p188_p8 }
   0xd   : > { %p214_p10 = scmp.lt.s32.totalorder (!%p189_p9), %s696_s22, 1  ;;  %s211_s13 = sand.u32 (!%p189_p9), 1, %s630_s19  }
   0xe   : > { %192 = sbr.rel (%p189_p9) target bundleno = 449 (0x1c1), region = 40  ;;  %s494_s14 = sshll.u32 (!%p189_p9), %s211_s13, 4 }
   0xf   : > { %s213_s15 = scalar_lea.vmem (!%p189_p9), [#allocation2], %s494_s14  ;;  %s500_s17 = sshll.u32 (!%p189_p9), %s696_s22, 7 }
  0x10   : > { %s431_s16 = sshll.u32 (!%p189_p9), %s213_s15, 4  ;;  %s770_s26 = scalar_lea.hbm (!%p189_p9), %s820_s5, %s500_s17  ;;  %s765_s16 = int_to_ptr.vmem [resolvable:$true] %s431_s16 }
  0x11   : > { %s578_s30 = scalar_lea.vmem (!%p189_p9), %s765_s16, 256  ;;  %s641_s6 = smov (!%p189_p9), [#allocation2]  }
  0x12   : > { %p579_p11 = scmp.ne.s32.totalorder (!%p189_p9), %s765_s16, %s578_s30 }
  0x13   : > { %v247_v0 = vld [vmem:[%s817_s2 + $0x10] sm:$0xf]  ;;  %v640_v2 = vmov 0   ;;  %v219_v3 = vld [vmem:[%s816_s1 + $0x8] sm:$0xff]  ;;  %v218_v4 = vld [vmem:[%s816_s1] sm:$0xff]  ;;  %vm283_vm0 = vcmask 162816   ;;  %v369_v27 = vlaneseq }
  0x14   : > { %v220_v1 = vld [vmem:[%s816_s1 + $0x10] sm:$0xf]  ;;  %561 = vset.pattern.permute.xlu1 %v640_v2  ;;  %560 = vset.pattern.permute.xlu0 %v640_v2  ;;  %v246_v5 = vld [vmem:[%s817_s2 + $0x8] sm:$0xff]  ;;  %v245_v6 = vld [vmem:[%s817_s2] sm:$0xff]  ;;  %s215_s7 = scalar_select %p214_p10, %s696_s22, 1  ;;  %vm290_vm1 = vcmask 1043456  }
  0x15   : > { %260 = vperm.xlu1 %561, %v247_v0   ;;  %233 = vperm.xlu0 %560, %v220_v1   ;;  %v271_v7 = vld [vmem:[%s819_s4] sm:$0xff]  ;;  %v272_v8 = vld [vmem:[%s819_s4 + $0x8] sm:$0x7f]  ;;  %v370_v28 = vshrl.u32 %v369_v27, 7  ;;  %vm382_vm4 = vcmask 1046528   ;;  %s775_s22 = scalar_lea.sflag [#allocation3], %s211_s13  ;;  %p580_p12 = pnand %p579_p11, %p713_p5 }
  0x16   : > { %v269_v9 = vld [vmem:[%s818_s3] sm:$0xff]  ;;  %s216_s10 = scalar_lea.vmem %s815_s0, %s215_s7  ;;  %v270_v26 = vld [vmem:[%s818_s3 + $0x8] sm:$0x7f]  ;;  %s582_s7 = sshll.u32 %s641_s6, 4  ;;  %s583_s7 = int_to_ptr.vmem [resolvable:$false] %s582_s7 }
  0x17   : > { %514 = vmatprep.mubr.msk.f32.mxu0 %vm283_vm0, %v269_v9  ;;  %v495_v10 = vld [vmem:[%s216_s10] ss:$0 sm:$0xff]  ;;  %vm372_vm2 = vcmp.lt.s32.totalorder %v370_v28, 5  ;;  %v371_v40 = vadd.s32 8, %v370_v28  ;;  %vm374_vm5 = vcmp.ge.s32.totalorder %v370_v28, 5  ;;  %p581_p13 = pneg %p580_p12  ;;  %s584_s8 = scalar_lea.vmem %s583_s7, 512 }
  0x18   : > { %p585_p0 = scmp.lt.s32.totalorder %s765_s16, %s583_s7  ;;  %p586_p1 = scmp.lt.s32.totalorder %s584_s8, %s578_s30 }
  0x19   : > { %228 = vperm.xlu0 %560, %v219_v3   ;;  %223 = vperm.xlu1 %561, %v218_v4   ;;  %vm377_vm3 = vcmp.lt.s32.totalorder %v371_v40, 10 }
  0x1a   : > { %p587_p2 = por %p586_p1, %p585_p0 }
  0x1c   : > { %p588_p3 = pnand %p587_p2, %p581_p13 }
  0x1d   : > { %255 = vperm.xlu0 %560, %v246_v5   ;;  %250 = vperm.xlu1 %561, %v245_v6  }
  0x21   : > { %275 = vperm.xlu0 %560, %v271_v7   ;;  %280 = vperm.xlu1 %561, %v272_v8  }
  0x90   : > { %v261_v11 = vpop.permute.xlu1 %260  ;;  %v234_v12 = vpop.permute.xlu0 %233 }
  0x91   : > { %v244_v13 = vmul.f32 %v495_v10, %v234_v12 }
  0x93   : > { %v265_v14 = vadd.f32 %v261_v11, %v244_v13 }
  0x94   : > { %v229_v15 = vpop.permute.xlu0 %228  ;;  %v224_v16 = vpop.permute.xlu1 %223 }
  0x95   : > { %562 = vtanh.f32 %v265_v14  ;;  %v243_v17 = vmul.f32 %v495_v10, %v229_v15  ;;  %v242_v18 = vmul.f32 %v495_v10, %v224_v16 }
  0x98   : > { %v256_v19 = vpop.permute.xlu0 %255  ;;  %v251_v20 = vpop.permute.xlu1 %250 }
  0x99   : > { %v264_v21 = vadd.f32 %v256_v19, %v243_v17  ;;  %v263_v22 = vadd.f32 %v251_v20, %v242_v18 }
  0x9b   : > { %564 = vtanh.f32 %v264_v21 }
  0x9c   : > { %566 = vtanh.f32 %v263_v22  ;;  %v281_v29 = vpop.permute.xlu1 %280  ;;  %v276_v32 = vpop.permute.xlu0 %275 }
  0xa2   : > { %v563_v23 = vpop.eup %562 }
  0xa3   : > { %508 = vmatprep.subr.msk.mxu0 %vm290_vm1, %v563_v23 }
  0xa4   : > { %509 = vmatpush3.msk.msra.mxu0 %vm290_vm1, %v563_v23 }
  0xa8   : > { %v565_v24 = vpop.eup %564 }
  0xa9   : > { %510 = vmatprep.subr.mxu0 %v565_v24  ;;  %v567_v25 = vpop.eup %566 }
  0xaa   : > { %511 = vmatpush3.msra.mxu0 %v565_v24 }
  0xab   : > { %512 = vmatprep.subr.mxu0 %v567_v25 }
  0xac   : > { %513 = vmatpush3.msra.mxu0 %v567_v25 }
  0xad   : > { %515 = vmatmul.mubr.msk.f32.vlgmr.msra.gmra.mxu0 %vm283_vm0, %v270_v26 }
 0x16d   : > { %v516_v30 = vpop.f32.mrf.mxu0 }
 0x16e   : > { %v366_v31 = vadd.f32 %v516_v30, %v281_v29 }
 0x16f   : > { %v360_v33 = vpop.f32.mrf.mxu0 }
 0x170   : > { %v410_v34 = vmul.f32 1.442695, %v366_v31  ;;  %v361_v35 = vadd.f32 %v360_v33, %v276_v32 }
 0x172   : > { %568 = vpow2.f32 %v410_v34  ;;  %v380_v36 = vsel %vm372_vm2, %v361_v35, -inf  ;;  %v408_v58 = vmul.f32 1.442695, %v361_v35 }
 0x173   : > { %v385_v37 = vrot.slane %v380_v36, 4 }
 0x175   : > { %v386_v38 = vmax.f32 %v380_v36, %v385_v37 }
 0x177   : > { %v387_v39 = vrot.slane %v386_v38, 2 }
 0x179   : > { %v388_v41 = vmax.f32 %v386_v38, %v387_v39 }
 0x17b   : > { %v389_v42 = vrot.slane %v388_v41, 1 }
 0x17d   : > { %v390_v43 = vmax.f32 %v388_v41, %v389_v42 }
 0x17f   : > { %v569_v44 = vpop.eup %568  ;;  %v391_v45 = vsub.f32 %v380_v36, %v390_v43  ;;  %v392_v46 = vsub.f32 -inf, %v390_v43 }
 0x180   : > { %v413_v47 = vsel %vm377_vm3, %v569_v44, %v366_v31 }
 0x181   : > { %417 = vst [vmem:[%s213_s15 + $0x8] sm:$0x7f] %v413_v47  ;;  %v393_v48 = vmul.f32 1.442695, %v391_v45  ;;  %v395_v49 = vmul.f32 1.442695, %v392_v46 }
 0x183   : > { %570 = vpow2.f32 %v393_v48 }
 0x184   : > { %572 = vpow2.f32 %v395_v49 }
 0x185   : > { %574 = vpow2.f32 %v408_v58 }
 0x190   : > { %v571_v50 = vpop.eup %570 }
 0x191   : > { %v573_v51 = vpop.eup %572 }
 0x192   : > { %v397_v52 = vsel %vm382_vm4, %v573_v51, 0.0  ;;  %v575_v61 = vpop.eup %574 }
 0x193   : > { %v398_v53 = vadd.f32 %v571_v50, %v397_v52  ;;  %v412_v0 = vsel %vm374_vm5, %v575_v61, %v361_v35 }
 0x195   : > { %v399_v54 = vrot.slane %v398_v53, 4 }
 0x197   : > { %v400_v55 = vadd.f32 %v399_v54, %v398_v53 }
 0x199   : > { %v401_v56 = vrot.slane %v400_v55, 2 }
 0x19b   : > { %v402_v57 = vadd.f32 %v401_v56, %v400_v55 }
 0x19d   : > { %v403_v59 = vrot.slane %v402_v57, 1 }
 0x19f   : > { %v404_v60 = vadd.f32 %v403_v59, %v402_v57 }
 0x1a1   : > { %576 = vrcp.f32 %v404_v60 }
 0x1ae   : > { %v577_v62 = vpop.eup %576 }
 0x1af   : > { %v406_v63 = vmul.f32 %v577_v62, %v571_v50 }
 0x1b1   : > { %v414_v1 = vsel %vm372_vm2, %v406_v63, %v412_v0 }
 0x1b2   : > { %416 = vst [vmem:[%s213_s15] sm:$0xff] %v414_v1 }
 0x1b3   : > { %591 = shalt.err (!%p588_p3)
}
 0x1b4   : > { %s592_s9 = scalar_lea.hbm %s770_s26, 256  ;;  %s596_s12 = scalar_lea.hbm %s820_s5, 512 }
 0x1b5   : > { %p593_p4 = scmp.ne.s32.totalorder %s770_s26, %s592_s9  ;;  %p597_p9 = scmp.lt.s32.totalorder %s770_s26, %s820_s5 }
 0x1b6   : > { %p598_p10 = scmp.lt.s32.totalorder %s596_s12, %s592_s9 }
 0x1b7   : > { %p594_p7 = pnand %p593_p4, %p713_p5 }
 0x1b8   : > { %p599_p11 = por %p598_p10, %p597_p9 }
 0x1b9   : > { %p595_p8 = pneg %p594_p7 }
 0x1bb   : > { %p600_p12 = pnand %p599_p11, %p595_p8 }
 0x1bd   : > { %603 = shalt.err (!%p600_p12)
}
 0x1be   : > { %s642_s15 = smov 128   ;;  %s643_s17 = smov 256  }
 0x1bf   : > { %s644_s23 = smov 8  }
 0x1c0   : > { %517 = dma.vmem_to_hbm [thread:$0]  (%p713_p5), %s765_s16, 256, %s770_s26, %s775_s22, %s642_s15, %s643_s17, %s644_s23  }
 0x1c1 PF: > { %p523_p13 = scmp.ge.s32.totalorder %s638_s21, 2  ;;  %s446_s25 = sand.u32 1, %s626_s18  }
 0x1c2   : > { %s447_s30 = scalar_lea.sflag [#allocation3], %s446_s25 }
 0x1c3   : > { %p520_p0 = pnand %p523_p13, %p717_p6 }
 0x1c5   : > { %p521_p1 = pneg %p520_p0 }
 0x1c7   : > { %621 = dma.done.wait (%p521_p1), %s447_s30, 256  }
 0x1c8   : > { %623 = vsyncadd (%p521_p1), %s447_s30, 4294967040  ;;  %p15_p2 = scmp.ge.s32.totalorder %s700_s24, 4   ;;  %s823_s18 = smov %s630_s19 }
 0x1c9   : > { %s824_s19 = smov %s634_s20  ;;  %s825_s20 = smov %s711_s27 }
 0x1ca   : > { %s826_s21 = smov %s700_s24  ;;  %17 = sbr.rel (!%p15_p2) target bundleno = 3 (0x3), region = 75 }
 0x1cf   :  { %452 = vsyncpa [#allocation3], 1 }
 0x1d0   :  { %454 = vsyncpa [#allocation3 + $0x1], 1 }

</bundles_post_ra>
